<compile_context>
chip_gen: v5e
topology: v5e:2x2
jax: 0.10.0
libtpu: 0.0.40
codegen_flags: <defaults>
</compile_context>

<pallas_src>
import jax
import jax.numpy as jnp
from jax.experimental import pallas as pl
from jax.experimental.pallas import tpu as pltpu


def _round_up(a: int, b: int) -> int:
    return (a + b - 1) // b * b


def _vmem_capacity_bytes() -> int:
    try:
        return int(pltpu.get_tpu_info().vmem_capacity_bytes)
    except Exception:
        # Conservative fallback = smallest per-TC VMEM (v7x).
        return 64 * 1024 * 1024


def vit_mlp_kernel(x_ref, w1_ref, b1_ref, w2_ref, b2_ref, o_ref, acc_ref):
    # x_ref:  (tm, D)   compute_dtype
    # w1_ref: (D, tf)   compute_dtype   (resident if num_f == 1)
    # b1_ref: (1, tf)   f32
    # w2_ref: (tf, D)   compute_dtype   (resident if num_f == 1)
    # b2_ref: (1, D)    f32
    # o_ref:  (tm, D)   output dtype
    # acc_ref:(tm, D)   f32 accumulator (persists across the F axis)
    j = pl.program_id(1)

    @pl.when(j == 0)
    def _init():
        acc_ref[...] = jnp.zeros_like(acc_ref)

    # First projection slice (f32 MXU accumulation).
    h = jnp.dot(x_ref[...], w1_ref[...], preferred_element_type=jnp.float32)
    h = h + b1_ref[...]                    # broadcast (1, tf) -> (tm, tf)
    h = h * jax.nn.sigmoid(1.702 * h)      # QuickGELU in f32 (EUP sigmoid)

    # Second projection slice, accumulated over the F (hidden) axis.
    acc_ref[...] += jnp.dot(h.astype(w2_ref.dtype), w2_ref[...],
                            preferred_element_type=jnp.float32)

    @pl.when(j == pl.num_programs(1) - 1)
    def _finalize():
        o_ref[...] = (acc_ref[...] + b2_ref[...]).astype(o_ref.dtype)


def _need_vmem_bytes(tm, tf, D, csz, osz):
    """Double-buffered tiles + f32 accumulator + f32 (tm, tf) intermediate."""
    dbuf = 2 * (tm * D * csz        # x tile
                + D * tf * csz      # w1 slice
                + tf * 4            # b1 slice
                + tf * D * csz      # w2 slice
                + D * 4             # b2
                + tm * D * osz)     # out tile
    scratch = tm * D * 4            # acc
    h_tmp = tm * tf * 4             # f32 activation intermediate
    return dbuf + scratch + h_tmp


def vit_mlp(x, w1, b1, w2, b2, *, tm=256, tf=None, compute_dtype=jnp.bfloat16):
    """ViTMLP forward.

    x: (M, D); w1: (D, F); b1: (F,); w2: (F, D); b2: (D,).
    Returns (M, D) in x.dtype. Matmuls run in `compute_dtype` (bf16 default)
    with f32 accumulation; QuickGELU and biases stay in f32.
    If tf is None, the hidden tile is auto-sized: tf = F (resident weights)
    whenever the full W1/W2 fit the generation-aware VMEM budget.
    """
    M, D = x.shape
    F = w1.shape[1]
    out_dtype = x.dtype
    csz = jnp.dtype(compute_dtype).itemsize
    osz = jnp.dtype(out_dtype).itemsize

    # --- M tiling: no multi-core cap; MXU-aligned tiles -----------------------
    if M <= tm:
        tm_eff = max(_round_up(M, 8), 8)          # single tile, minimal pad
    else:
        tm_eff = _round_up(max(tm, 128), 128)     # MXU-native multiple
    M_pad = _round_up(M, tm_eff)
    num_m = M_pad // tm_eff

    # --- F tiling: prefer VMEM-resident weights --------------------------------
    vmem_cap = _vmem_capacity_bytes()
    vmem_budget = int(vmem_cap * 0.80)            # ~100 MiB v5e/v6e, ~52 MiB v7x
    F_aligned = _round_up(F, 128)

    if tf is None:
        candidates = [F_aligned] + [c for c in (4096, 2048, 1024, 512, 256, 128)
                                    if c < F_aligned]
        tf_eff = candidates[-1]
        for cand in candidates:
            if _need_vmem_bytes(tm_eff, cand, D, csz, osz) <= vmem_budget:
                tf_eff = cand
                break
    else:
        tf_eff = min(_round_up(max(tf, 128), 128), F_aligned)

    F_pad = _round_up(F, tf_eff)
    num_f = F_pad // tf_eff

    # --- dtype casts & padding (skipped when already in the right form) -------
    x_c = x if x.dtype == compute_dtype else x.astype(compute_dtype)
    w1_c = w1 if w1.dtype == compute_dtype else w1.astype(compute_dtype)
    w2_c = w2 if w2.dtype == compute_dtype else w2.astype(compute_dtype)
    b1_2d = b1.astype(jnp.float32).reshape(1, F)
    b2_2d = b2.astype(jnp.float32).reshape(1, D)

    if M_pad != M:
        x_c = jnp.pad(x_c, ((0, M_pad - M), (0, 0)))
    if F_pad != F:
        # Zero-padded hidden columns contribute exactly 0:
        # quick_gelu(0 + 0) = 0, and 0 @ W2_pad_rows = 0.
        w1_c = jnp.pad(w1_c, ((0, 0), (0, F_pad - F)))
        b1_2d = jnp.pad(b1_2d, ((0, 0), (0, F_pad - F)))
        w2_c = jnp.pad(w2_c, ((0, F_pad - F), (0, 0)))

    # --- VMEM limit: sized to actual need, generation-aware cap ----------------
    needed = _need_vmem_bytes(tm_eff, tf_eff, D, csz, osz)
    vmem_limit = int(max(needed * 1.2, 32 * 1024 * 1024))
    vmem_limit = min(vmem_limit, int(vmem_cap * 0.95))
    vmem_limit = max(vmem_limit, min(int(needed * 1.05), int(vmem_cap * 0.95)))

    # Weights are fetched once when num_f == 1 (constant index_map), otherwise
    # re-streamed per M tile.
    w_stream_factor = 1 if num_f == 1 else num_m
    cost = pl.CostEstimate(
        flops=4 * M_pad * D * F_pad,
        transcendentals=M_pad * F_pad,
        bytes_accessed=(M_pad * D * csz
                        + w_stream_factor * (D * F_pad + F_pad * D) * csz
                        + F_pad * 4 + D * 4
                        + M_pad * D * osz),
    )

    grid_spec = pltpu.PrefetchScalarGridSpec(
        num_scalar_prefetch=0,
        grid=(num_m, num_f),
        in_specs=[
            pl.BlockSpec((tm_eff, D), lambda i, j: (i, 0)),   # x tile
            pl.BlockSpec((D, tf_eff), lambda i, j: (0, j)),   # w1 (resident if num_f==1)
            pl.BlockSpec((1, tf_eff), lambda i, j: (0, j)),   # b1 slice
            pl.BlockSpec((tf_eff, D), lambda i, j: (j, 0)),   # w2 (resident if num_f==1)
            pl.BlockSpec((1, D), lambda i, j: (0, 0)),        # b2
        ],
        out_specs=pl.BlockSpec((tm_eff, D), lambda i, j: (i, 0)),
        scratch_shapes=[pltpu.VMEM((tm_eff, D), jnp.float32)],
    )

    out = pl.pallas_call(
        vit_mlp_kernel,
        out_shape=jax.ShapeDtypeStruct((M_pad, D), out_dtype),
        grid_spec=grid_spec,
        compiler_params=pltpu.CompilerParams(
            dimension_semantics=("parallel", "arbitrary"),
            vmem_limit_bytes=vmem_limit,
        ),
        cost_estimate=cost,
    )(x_c, w1_c, b1_2d, w2_c, b2_2d)

    return out[:M] if M_pad != M else out


def vit_mlp_ref(x, w1, b1, w2, b2, compute_dtype=jnp.float32):
    cd = compute_dtype
    h = jnp.dot(x.astype(cd), w1.astype(cd),
                preferred_element_type=jnp.float32) + b1.astype(jnp.float32)
    h = h * jax.nn.sigmoid(1.702 * h)
    o = jnp.dot(h.astype(cd), w2.astype(cd),
                preferred_element_type=jnp.float32) + b2.astype(jnp.float32)
    return o.astype(x.dtype)


if __name__ == "__main__":
    # Small shapes consistent with the module (emb_dim -> mlp_dim -> emb_dim),
    # scaled down from (1024, 4096) to (128, 256). SEQ=20 is deliberately not a
    # multiple of the tile size to exercise the cdiv + padding path (mirrors
    # real ViT seq lengths like 577).
    SEQ, EMB, MLP = 20, 128, 256

    key = jax.random.PRNGKey(0)
    kx, kw1, kb1, kw2, kb2 = jax.random.split(key, 5)

    x = jax.random.normal(kx, (SEQ, EMB), dtype=jnp.float32)
    w1 = jax.random.normal(kw1, (EMB, MLP), dtype=jnp.float32) / jnp.sqrt(EMB)
    b1 = jax.random.normal(kb1, (MLP,), dtype=jnp.float32) * 0.01
    w2 = jax.random.normal(kw2, (MLP, EMB), dtype=jnp.float32) / jnp.sqrt(MLP)
    b2 = jax.random.normal(kb2, (EMB,), dtype=jnp.float32) * 0.01

    # 1) f32, streamed F (tf=128 forces a 2-step reduction -> exercises the
    #    accumulator init/finalize path). Tight check vs reference.
    out_f32 = vit_mlp(x, w1, b1, w2, b2, tf=128, compute_dtype=jnp.float32)
    jax.block_until_ready(out_f32)
    ref_f32 = vit_mlp_ref(x, w1, b1, w2, b2, compute_dtype=jnp.float32)
    assert out_f32.shape == (SEQ, EMB) and out_f32.dtype == x.dtype
    assert jnp.allclose(out_f32, ref_f32, atol=1e-4, rtol=1e-4), \
        "f32 (streamed) mismatch vs reference"

    # 2) bf16 production path with auto tf -> resident weights (num_f == 1).
    out_bf16 = vit_mlp(x, w1, b1, w2, b2, compute_dtype=jnp.bfloat16)
    jax.block_until_ready(out_bf16)
    ref_bf16 = vit_mlp_ref(x, w1, b1, w2, b2, compute_dtype=jnp.bfloat16)
    assert jnp.allclose(out_bf16, ref_bf16, atol=2e-2, rtol=2e-2), \
        "bf16 (resident-weights) mismatch vs reference"

    # 3) bf16 with streamed F slices (tf=128) for coverage of both paths.
    out_bf16_s = vit_mlp(x, w1, b1, w2, b2, tf=128, compute_dtype=jnp.bfloat16)
    jax.block_until_ready(out_bf16_s)
    assert jnp.allclose(out_bf16_s, ref_bf16, atol=2e-2, rtol=2e-2), \
        "bf16 (streamed) mismatch vs reference"

    print("KERNEL_OK")
</pallas_src>

<mosaic_0001>
module attributes {stable_mosaic.version = 11 : i64} {
  func.func @vit_mlp_kernel(%arg0: i32, %arg1: i32, %arg2: memref<24x128xf32, #tpu.memory_space<vmem>>, %arg3: memref<128x128xf32, #tpu.memory_space<vmem>>, %arg4: memref<1x128xf32, #tpu.memory_space<vmem>>, %arg5: memref<128x128xf32, #tpu.memory_space<vmem>>, %arg6: memref<1x128xf32, #tpu.memory_space<vmem>>, %arg7: memref<24x128xf32, #tpu.memory_space<vmem>>, %arg8: memref<24x128xf32, #tpu.memory_space<vmem>>) attributes {dimension_semantics = [#tpu.dimension_semantics<parallel>, #tpu.dimension_semantics<arbitrary>], iteration_bounds = array<i64: 1, 2>, scalar_prefetch = 0 : i64, scratch_operands = 1 : i64, tpu.core_type = #tpu.core_type<tc>, window_params = [{transform_indices = @transform_0, window_bounds = array<i64: 24, 128>}, {transform_indices = @transform_1, window_bounds = array<i64: 128, 128>}, {transform_indices = @transform_2, window_bounds = array<i64: 1, 128>}, {transform_indices = @transform_3, window_bounds = array<i64: 128, 128>}, {pipeline_mode = #tpu.pipeline_mode<synchronous>, transform_indices = @transform_4, window_bounds = array<i64: 1, 128>}, {transform_indices = @transform_5, window_bounds = array<i64: 24, 128>}]} {
    %c0_i32 = arith.constant 0 : i32
    %0 = arith.cmpi eq, %arg1, %c0_i32 : i32
    %1 = arith.extui %0 : i1 to i32
    %c0_i32_0 = arith.constant 0 : i32
    %2 = arith.cmpi ne, %1, %c0_i32_0 : i32
    scf.if %2 {
      %cst_16 = arith.constant 0.000000e+00 : f32
      %25 = vector.broadcast %cst_16 : f32 to vector<24x128xf32>
      %c0_17 = arith.constant 0 : index
      %c0_18 = arith.constant 0 : index
      %26 = vector.load %arg8[%c0_17, %c0_18] : memref<24x128xf32, #tpu.memory_space<vmem>>, vector<24x128xf32>
      tpu.vector_store %arg8[%c0_17, %c0_18], %25 {strides = array<i32>} : memref<24x128xf32, #tpu.memory_space<vmem>>, vector<24x128xf32>,
    } else {
    }
    %c0 = arith.constant 0 : index
    %c0_1 = arith.constant 0 : index
    %3 = vector.load %arg2[%c0, %c0_1] : memref<24x128xf32, #tpu.memory_space<vmem>>, vector<24x128xf32>
    %c0_2 = arith.constant 0 : index
    %c0_3 = arith.constant 0 : index
    %4 = vector.load %arg3[%c0_2, %c0_3] : memref<128x128xf32, #tpu.memory_space<vmem>>, vector<128x128xf32>
    %cst = arith.constant dense<0.000000e+00> : vector<24x128xf32>
    %5 = tpu.matmul %3, %4, %cst {dimension_numbers = #tpu.dot_dimension_numbers<[1], [0], [0], [1], [0, 0, 1, 1], [], []>} : vector<24x128xf32>, vector<128x128xf32>, vector<24x128xf32> -> vector<24x128xf32>
    %c0_4 = arith.constant 0 : index
    %c0_5 = arith.constant 0 : index
    %6 = vector.load %arg4[%c0_4, %c0_5] : memref<1x128xf32, #tpu.memory_space<vmem>>, vector<1x128xf32>
    %7 = vector.broadcast %6 : vector<1x128xf32> to vector<24x128xf32>
    %8 = arith.addf %5, %7 : vector<24x128xf32>
    %cst_6 = arith.constant 1.702000e+00 : f32
    %9 = vector.broadcast %cst_6 : f32 to vector<24x128xf32>
    %10 = arith.mulf %9, %8 : vector<24x128xf32>
    %11 = arith.negf %10 : vector<24x128xf32>
    %12 = math.exp %11 : vector<24x128xf32>
    %cst_7 = arith.constant 1.000000e+00 : f32
    %13 = vector.broadcast %cst_7 : f32 to vector<24x128xf32>
    %14 = arith.addf %13, %12 : vector<24x128xf32>
    %15 = arith.divf %13, %14 : vector<24x128xf32>
    %16 = arith.mulf %8, %15 : vector<24x128xf32>
    %c0_8 = arith.constant 0 : index
    %c0_9 = arith.constant 0 : index
    %17 = vector.load %arg8[%c0_8, %c0_9] : memref<24x128xf32, #tpu.memory_space<vmem>>, vector<24x128xf32>
    %c0_10 = arith.constant 0 : index
    %c0_11 = arith.constant 0 : index
    %18 = vector.load %arg5[%c0_10, %c0_11] : memref<128x128xf32, #tpu.memory_space<vmem>>, vector<128x128xf32>
    %cst_12 = arith.constant dense<0.000000e+00> : vector<24x128xf32>
    %19 = tpu.matmul %16, %18, %cst_12 {dimension_numbers = #tpu.dot_dimension_numbers<[1], [0], [0], [1], [0, 0, 1, 1], [], []>} : vector<24x128xf32>, vector<128x128xf32>, vector<24x128xf32> -> vector<24x128xf32>
    %20 = arith.addf %17, %19 : vector<24x128xf32>
    %c0_13 = arith.constant 0 : index
    %c0_14 = arith.constant 0 : index
    %21 = vector.load %arg8[%c0_13, %c0_14] : memref<24x128xf32, #tpu.memory_space<vmem>>, vector<24x128xf32>
    tpu.vector_store %arg8[%c0_13, %c0_14], %20 {strides = array<i32>} : memref<24x128xf32, #tpu.memory_space<vmem>>, vector<24x128xf32>,
    %c1_i32 = arith.constant 1 : i32
    %22 = arith.cmpi eq, %arg1, %c1_i32 : i32
    %23 = arith.extui %22 : i1 to i32
    %c0_i32_15 = arith.constant 0 : i32
    %24 = arith.cmpi ne, %23, %c0_i32_15 : i32
    scf.if %24 {
      %c0_16 = arith.constant 0 : index
      %c0_17 = arith.constant 0 : index
      %25 = vector.load %arg8[%c0_16, %c0_17] : memref<24x128xf32, #tpu.memory_space<vmem>>, vector<24x128xf32>
      %c0_18 = arith.constant 0 : index
      %c0_19 = arith.constant 0 : index
      %26 = vector.load %arg6[%c0_18, %c0_19] : memref<1x128xf32, #tpu.memory_space<vmem>>, vector<1x128xf32>
      %27 = vector.broadcast %26 : vector<1x128xf32> to vector<24x128xf32>
      %28 = arith.addf %25, %27 : vector<24x128xf32>
      %c0_20 = arith.constant 0 : index
      %c0_21 = arith.constant 0 : index
      %29 = vector.load %arg7[%c0_20, %c0_21] : memref<24x128xf32, #tpu.memory_space<vmem>>, vector<24x128xf32>
      tpu.vector_store %arg7[%c0_20, %c0_21], %28 {strides = array<i32>} : memref<24x128xf32, #tpu.memory_space<vmem>>, vector<24x128xf32>,
    } else {
    }
    return
  }
  func.func @transform_0(%arg0: i32, %arg1: i32) -> (i32, i32) {
    %c0_i32 = arith.constant 0 : i32
    %c0_i32_0 = arith.constant 0 : i32
    return %arg0, %c0_i32 : i32, i32
  }
  func.func @transform_1(%arg0: i32, %arg1: i32) -> (i32, i32) {
    %c0_i32 = arith.constant 0 : i32
    %c0_i32_0 = arith.constant 0 : i32
    return %c0_i32, %arg1 : i32, i32
  }
  func.func @transform_2(%arg0: i32, %arg1: i32) -> (i32, i32) {
    %c0_i32 = arith.constant 0 : i32
    %c0_i32_0 = arith.constant 0 : i32
    return %c0_i32, %arg1 : i32, i32
  }
  func.func @transform_3(%arg0: i32, %arg1: i32) -> (i32, i32) {
    %c0_i32 = arith.constant 0 : i32
    %c0_i32_0 = arith.constant 0 : i32
    return %arg1, %c0_i32 : i32, i32
  }
  func.func @transform_4(%arg0: i32, %arg1: i32) -> (i32, i32) {
    %c0_i32 = arith.constant 0 : i32
    %c0_i32_0 = arith.constant 0 : i32
    %c0_i32_1 = arith.constant 0 : i32
    return %c0_i32, %c0_i32_0 : i32, i32
  }
  func.func @transform_5(%arg0: i32, %arg1: i32) -> (i32, i32) {
    %c0_i32 = arith.constant 0 : i32
    %c0_i32_0 = arith.constant 0 : i32
    return %arg0, %c0_i32 : i32, i32
  }
}

</mosaic_0001>

<bundles_post_ra>
// kernel: tpu_custom_call.1
= control target key start
LH: loop header
LB: loop body
LE: loop exit
PB: predicated region body
PF: predicated region fallthrough
CT: control target
= control target key end

     0   :  { %s1279_s0 = inlined_call_operand.hbm [shape: f32[24,128], index: 0, kind: input, shape index: {}]   ;;  %s1280_s1 = inlined_call_operand.hbm [shape: f32[128,256], index: 1, kind: input, shape index: {}]   ;;  %s1281_s2 = inlined_call_operand.hbm [shape: f32[1,256], index: 2, kind: input, shape index: {}]   ;;  %s1282_s3 = inlined_call_operand.hbm [shape: f32[256,128], index: 3, kind: input, shape index: {}]   ;;  %s1283_s4 = inlined_call_operand.vmem [shape: f32[1,128], index: 4, kind: input, shape index: {}]   ;;  %s1284_s5 = inlined_call_operand.hbm [shape: f32[24,128], index: 5, kind: output, shape index: {}]  }
   0x1   :  { %1286 = sst [smem:[#allocation17_spill]] %s1279_s0 }
   0x2   :  { %1287 = sst [smem:[#allocation18_spill]] %s1280_s1 }
   0x3   :  { %1288 = sst [smem:[#allocation19_spill]] %s1281_s2 }
   0x4   :  { %10 = vsyncpa [#allocation4], 0 }
   0x5   :  { %11 = vsyncpa [#allocation7], 0 }
   0x6   :  { %13 = vsyncpa [#allocation7 + $0x1], 0 }
   0x7   :  { %14 = vsyncpa [#allocation10], 0 }
   0x8   :  { %16 = vsyncpa [#allocation10 + $0x1], 0 }
   0x9   :  { %17 = vsyncpa [#allocation5], 0  ;;  %s1074_s18 = smov 0   ;;  %s1076_s19 = smov 0  }
   0xa   :  { %s1078_s20 = smov 0   ;;  %s1080_s21 = smov 0  }
   0xb   :  { %s1082_s22 = smov 0   ;;  %s1084_s23 = smov 0  }
   0xc LB: > { %s32_s24 = sadd.s32 1, %s1030_s22  ;;  %s68_s25 = sadd.s32 1, %s1022_s20  ;;  %s1034_s23 = sphi %s1084_s23, %s23_s23   ;;  %s1030_s22 = sphi %s1082_s22, %s1302_s22   ;;  %s1026_s21 = sphi %s1080_s21, %s1301_s21   ;;  %s1022_s20 = sphi %s1078_s20, %s1300_s20   ;;  %s1018_s19 = sphi %s1076_s19, %s1299_s19   ;;  %s1014_s18 = sphi %s1074_s18, %s1298_s18  }
   0xd   : > { %p33_p0 = scmp.ge.s32.totalorder %s32_s24, 2  ;;  %p75_p1 = scmp.ne.s32.totalorder %s1022_s20, %s1018_s19 }
   0xe   : > { %p76_p2 = scmp.eq.s32.totalorder %s1034_s23, 0  ;;  %p750_p5 = scmp.lt.s32.totalorder %s1034_s23, 2 }
   0xf   : > { %s1304_s24 = smov (%p33_p0, %s32_s24), 0  ;;  %s224_s28 = sand.u32 1, %s1034_s23  }
  0x10   : > { %1289 = sst [smem:[#allocation16_spill]] %s1304_s24  ;;  %p1111_p3 = por %p76_p2, %p75_p1 }
  0x11   : > { %s65_s27 = ssub.s32 %s1030_s22, %s1304_s24  ;;  %s1120_s29 = sand.u32 1, %s1022_s20  }
  0x12   : > { %p66_p4 = scmp.eq.s32.totalorder %s65_s27, 0  ;;  %s670_s6 = sshll.u32 %s1120_s29, 7 }
  0x13   : > { %s671_s7 = sshll.u32 %s1030_s22, 3  ;;  %s1291_s1 = sld [smem:[#allocation18_spill]] }
  0x14   : > { %s1123_s30 = scalar_select %p66_p4, %s1022_s20, %s68_s25  }
  0x15   : > { %s228_s11 = scalar_lea.vmem [#allocation6], %s670_s6  ;;  %p1134_p6 = pnand %p750_p5, %p1111_p3 }
  0x16   : > { %s235_s12 = sshll.u32 %s228_s11, 4  ;;  %s1138_s15 = scalar_lea.sflag [#allocation7], %s224_s28  ;;  %s236_s12 = int_to_ptr.vmem [resolvable:$true] %s235_s12 }
  0x17   : > { %s1036_s16 = smov 256   ;;  %s1037_s17 = smov 128  }
  0x18   : > { %s1038_s25 = smov 8   ;;  %s1146_s27 = sadd.s32 4294967295, %s1034_s23  }
  0x19   : > { %s232_s10 = scalar_lea.hbm %s1291_s1, %s671_s7  ;;  %p81_p7 = scmp.ne.s32.totalorder %s1018_s19, %s1014_s18 }
  0x1a   : > { %s233_s13 = sshll.u32 %s232_s10, 4  ;;  %p82_p8 = scmp.eq.s32.totalorder %s1146_s27, 0  ;;  %s234_s13 = int_to_ptr.hbm [resolvable:$true] %s233_s13 }
  0x1b   : > { %742 = dma.hbm_to_vmem [thread:$0]  (!%p1134_p6), %s234_s13, 2048, %s236_s12, %s1138_s15, %s1036_s16, %s1037_s17, %s1038_s25  }
  0x1c   : > { %p667_p9 = scmp.ge.s32.totalorder %s1034_s23, 1  ;;  %p191_p10 = scmp.lt.s32.totalorder %s1034_s23, 3 }
  0x1d   : > { %p1155_p11 = por %p82_p8, %p81_p7  ;;  %s1294_s0 = sld [smem:[#allocation17_spill]] }
  0x1e   : > { %p1162_p12 = pnand %p667_p9, %p191_p10  ;;  %s1039_s18 = smov [#allocation3]  }
  0x1f   : > { %s207_s10 = sshll.u32 %s1039_s18, 4  ;;  %s1296_s2 = sld [smem:[#allocation19_spill]]  ;;  %s208_s10 = int_to_ptr.vmem [resolvable:$true] %s207_s10 }
  0x20   : > { %p735_p13 = pneg %p1162_p12  ;;  %s248_s28 = scalar_lea.vmem [#allocation8], %s1120_s29 }
  0x21   : > { %s255_s7 = sshll.u32 %s248_s28, 4  ;;  %s688_s18 = sshll.u32 %s1030_s22, 7  ;;  %s256_s7 = int_to_ptr.vmem [resolvable:$true] %s255_s7 }
  0x22   : > { %p736_p0 = pnand %p735_p13, %p82_p8  ;;  %s263_s24 = scalar_lea.sflag [#allocation10], %s1120_s29 }
  0x23   : > { %s205_s8 = sshll.u32 %s1294_s0, 4  ;;  %s266_s0 = scalar_lea.vmem [#allocation9], %s670_s6  ;;  %s206_s8 = int_to_ptr.hbm [resolvable:$true] %s205_s8 }
  0x24   : > { %738 = dma.hbm_to_vmem [thread:$0]  (!%p736_p0), %s206_s8, 384, %s208_s10, [#allocation4], %s1037_s17, %s1037_s17, %s1038_s25  }
  0x25   : > { %s251_s13 = scalar_lea.hbm %s1296_s2, %s1030_s22  ;;  %s274_s11 = sshll.u32 %s266_s0, 4  ;;  %s275_s11 = int_to_ptr.vmem [resolvable:$true] %s274_s11 }
  0x26   : > { %s253_s16 = sshll.u32 %s251_s13, 4  ;;  %s271_s2 = scalar_lea.hbm %s1282_s3, %s688_s18  ;;  %s254_s16 = int_to_ptr.hbm [resolvable:$true] %s253_s16 }
  0x27   : > { %745 = dma.hbm_to_vmem [thread:$0]  (!%p1134_p6), %s254_s16, 16, %s256_s7, %s1138_s15  }
  0x28   : > { %s272_s13 = sshll.u32 %s271_s2, 4  ;;  %286 = sbr.rel (%p1162_p12) target bundleno = 421 (0x1a5), region = 40  ;;  %s273_s13 = int_to_ptr.hbm [resolvable:$true] %s272_s13 }
  0x29   : > { %748 = dma.hbm_to_vmem [thread:$0]  (!%p1134_p6), %s273_s13, 2048, %s275_s11, %s263_s24, %s1037_s17, %s1037_s17, %s1038_s25  }
  0x2d   : > { %997 = dma.done.wait (%p82_p8), [#allocation4], 384  }
  0x2e   : > { %999 = vsyncadd (%p82_p8), [#allocation4], 4294966912  ;;  %s293_s0 = sand.u32 1, %s1146_s27   ;;  %s1201_s1 = sand.u32 1, %s1018_s19  }
  0x2f   : > { %s677_s2 = sshll.u32 %s1201_s1, 7  ;;  %s294_s29 = scalar_lea.sflag [#allocation7], %s293_s0 }
  0x30   : > { %s1204_s6 = scalar_lea.vmem [#allocation6], %s677_s2 }
  0x31   : > { %1001 = dma.done.wait (%p1155_p11), %s294_s29, 2064  }
  0x32   : > { %1003 = vsyncadd (%p1155_p11), %s294_s29, 4294965232  ;;  %s306_s24 = scalar_lea.vmem [#allocation8], %s1201_s1  ;;  %s313_s14 = scalar_lea.sflag [#allocation10], %s1201_s1 }
  0x33   : > { %s1212_s15 = scalar_lea.vmem [#allocation9], %s677_s2 }
  0x34   : > { %1005 = dma.done.wait (%p1155_p11), %s313_s14, 2048  }
  0x35   : > { %1007 = vsyncadd (%p1155_p11), %s313_s14, 4294965248  ;;  %p679_p1 = scmp.ne.s32.totalorder %s1026_s21, 0 }
  0x37   : > { %354 = sbr.rel (%p679_p1) target bundleno = 64 (0x40), region = 60 }
  0x3c   : > { %v1040_v0 = vmov 0.0  }
  0x3d   : > { %355 = vst [vmem:[#allocation2 + $0x10] sm:$0xff] %v1040_v0 }
  0x3e   : > { %356 = vst [vmem:[#allocation2] sm:$0xff] %v1040_v0 }
  0x3f   : > { %357 = vst [vmem:[#allocation2 + $0x8] sm:$0xff] %v1040_v0 }
  0x40 PF: > { %v376_v1 = vld [vmem:[%s1204_s6 + $0x78] sm:$0xff]  ;;  %v375_v2 = vld [vmem:[%s1204_s6 + $0x70] sm:$0xff]  ;;  %v374_v3 = vld [vmem:[%s1204_s6 + $0x68] sm:$0xff]  ;;  %p683_p2 = scmp.ne.s32.totalorder %s1026_s21, 1 }
  0x41   : > { %381 = vmatpush.msra.mxu0 %v376_v1  ;;  %689 = vmatpush.msra.mxu2 %v376_v1  ;;  %v373_v4 = vld [vmem:[%s1204_s6 + $0x60] sm:$0xff]  ;;  %v372_v5 = vld [vmem:[%s1204_s6 + $0x58] sm:$0xff]  ;;  %v371_v6 = vld [vmem:[%s1204_s6 + $0x50] sm:$0xff] }
  0x42   : > { %v370_v7 = vld [vmem:[%s1204_s6 + $0x48] sm:$0xff]  ;;  %v369_v8 = vld [vmem:[%s1204_s6 + $0x40] sm:$0xff]  ;;  %v368_v9 = vld [vmem:[%s1204_s6 + $0x38] sm:$0xff] }
  0x43   : > { %382 = vmatpush.msra.mxu0 %v375_v2  ;;  %690 = vmatpush.msra.mxu2 %v375_v2  ;;  %v367_v10 = vld [vmem:[%s1204_s6 + $0x30] sm:$0xff]  ;;  %v366_v11 = vld [vmem:[%s1204_s6 + $0x28] sm:$0xff]  ;;  %v365_v12 = vld [vmem:[%s1204_s6 + $0x20] sm:$0xff] }
  0x44   : > { %v364_v13 = vld [vmem:[%s1204_s6 + $0x18] sm:$0xff]  ;;  %v363_v14 = vld [vmem:[%s1204_s6 + $0x10] sm:$0xff]  ;;  %v362_v15 = vld [vmem:[%s1204_s6 + $0x8] sm:$0xff] }
  0x45   : > { %383 = vmatpush.msra.mxu0 %v374_v3  ;;  %691 = vmatpush.msra.mxu2 %v374_v3  ;;  %v361_v16 = vld [vmem:[%s1204_s6] sm:$0xff]  ;;  %v358_v17 = vld [vmem:[#allocation3] sm:$0xff]  ;;  %v359_v18 = vld [vmem:[#allocation3 + $0x8] sm:$0xff] }
  0x46   : > { %v360_v19 = vld [vmem:[#allocation3 + $0x10] sm:$0xff]  ;;  %v486_v22 = vld [vmem:[%s1212_s15 + $0x68] sm:$0xff]  ;;  %v485_v23 = vld [vmem:[%s1212_s15 + $0x60] sm:$0xff] }
  0x47   : > { %384 = vmatpush.msra.mxu0 %v373_v4  ;;  %692 = vmatpush.msra.mxu2 %v373_v4  ;;  %v488_v20 = vld [vmem:[%s1212_s15 + $0x78] sm:$0xff]  ;;  %v487_v21 = vld [vmem:[%s1212_s15 + $0x70] sm:$0xff]  ;;  %v482_v26 = vld [vmem:[%s1212_s15 + $0x48] sm:$0xff] }
  0x48   : > { %489 = vmatpush.msra.mxu1 %v488_v20  ;;  %705 = vmatpush.msra.mxu3 %v488_v20  ;;  %v484_v24 = vld [vmem:[%s1212_s15 + $0x58] sm:$0xff]  ;;  %v483_v25 = vld [vmem:[%s1212_s15 + $0x50] sm:$0xff]  ;;  %v481_v27 = vld [vmem:[%s1212_s15 + $0x40] sm:$0xff] }
  0x49   : > { %385 = vmatpush.msra.mxu0 %v372_v5  ;;  %693 = vmatpush.msra.mxu2 %v372_v5  ;;  %v480_v28 = vld [vmem:[%s1212_s15 + $0x38] sm:$0xff]  ;;  %v479_v29 = vld [vmem:[%s1212_s15 + $0x30] sm:$0xff]  ;;  %v478_v30 = vld [vmem:[%s1212_s15 + $0x28] sm:$0xff] }
  0x4a   : > { %490 = vmatpush.msra.mxu1 %v487_v21  ;;  %706 = vmatpush.msra.mxu3 %v487_v21  ;;  %v477_v31 = vld [vmem:[%s1212_s15 + $0x20] sm:$0xff]  ;;  %v476_v32 = vld [vmem:[%s1212_s15 + $0x18] sm:$0xff]  ;;  %v810_v33 = vld [vmem:[%s306_s24] ss:$0 sm:$0xff] }
  0x4b   : > { %386 = vmatpush.msra.mxu0 %v371_v6  ;;  %694 = vmatpush.msra.mxu2 %v371_v6  ;;  %v475_v34 = vld [vmem:[%s1212_s15 + $0x10] sm:$0xff]  ;;  %v474_v35 = vld [vmem:[%s1212_s15 + $0x8] sm:$0xff]  ;;  %v473_v36 = vld [vmem:[%s1212_s15] sm:$0xff] }
  0x4c   : > { %491 = vmatpush.msra.mxu1 %v486_v22  ;;  %707 = vmatpush.msra.mxu3 %v486_v22 }
  0x4d   : > { %387 = vmatpush.msra.mxu0 %v370_v7  ;;  %695 = vmatpush.msra.mxu2 %v370_v7 }
  0x4e   : > { %492 = vmatpush.msra.mxu1 %v485_v23  ;;  %708 = vmatpush.msra.mxu3 %v485_v23 }
  0x4f   : > { %388 = vmatpush.msra.mxu0 %v369_v8  ;;  %696 = vmatpush.msra.mxu2 %v369_v8 }
  0x50   : > { %493 = vmatpush.msra.mxu1 %v484_v24  ;;  %709 = vmatpush.msra.mxu3 %v484_v24  ;;  %v470_v24 = vld [vmem:[#allocation2 + $0x10] sm:$0xff] }
  0x51   : > { %389 = vmatpush.msra.mxu0 %v368_v9  ;;  %697 = vmatpush.msra.mxu2 %v368_v9 }
  0x52   : > { %494 = vmatpush.msra.mxu1 %v483_v25  ;;  %710 = vmatpush.msra.mxu3 %v483_v25 }
  0x53   : > { %390 = vmatpush.msra.mxu0 %v367_v10  ;;  %698 = vmatpush.msra.mxu2 %v367_v10 }
  0x54   : > { %495 = vmatpush.msra.mxu1 %v482_v26  ;;  %711 = vmatpush.msra.mxu3 %v482_v26 }
  0x55   : > { %391 = vmatpush.msra.mxu0 %v366_v11  ;;  %699 = vmatpush.msra.mxu2 %v366_v11 }
  0x56   : > { %496 = vmatpush.msra.mxu1 %v481_v27  ;;  %712 = vmatpush.msra.mxu3 %v481_v27  ;;  %v471_v27 = vld [vmem:[#allocation2] sm:$0xff] }
  0x57   : > { %392 = vmatpush.msra.mxu0 %v365_v12  ;;  %700 = vmatpush.msra.mxu2 %v365_v12 }
  0x58   : > { %497 = vmatpush.msra.mxu1 %v480_v28  ;;  %713 = vmatpush.msra.mxu3 %v480_v28 }
  0x59   : > { %393 = vmatpush.msra.mxu0 %v364_v13  ;;  %701 = vmatpush.msra.mxu2 %v364_v13 }
  0x5a   : > { %498 = vmatpush.msra.mxu1 %v479_v29  ;;  %714 = vmatpush.msra.mxu3 %v479_v29 }
  0x5b   : > { %394 = vmatpush.msra.mxu0 %v363_v14  ;;  %702 = vmatpush.msra.mxu2 %v363_v14 }
  0x5c   : > { %499 = vmatpush.msra.mxu1 %v478_v30  ;;  %715 = vmatpush.msra.mxu3 %v478_v30  ;;  %v472_v30 = vld [vmem:[#allocation2 + $0x8] sm:$0xff] }
  0x5d   : > { %395 = vmatpush.msra.mxu0 %v362_v15  ;;  %703 = vmatpush.msra.mxu2 %v362_v15 }
  0x5e   : > { %500 = vmatpush.msra.mxu1 %v477_v31  ;;  %716 = vmatpush.msra.mxu3 %v477_v31 }
  0x5f   : > { %396 = vmatpush.msra.mxu0 %v361_v16  ;;  %704 = vmatpush.msra.mxu2 %v361_v16 }
  0x60   : > { %397 = vmatmul.f32.vlgmr.msra.gmra.mxu0 %v358_v17  ;;  %400 = vmatmul.f32.vlgmr.msra.gmra.mxu2 %v359_v18 }
  0x61   : > { %501 = vmatpush.msra.mxu1 %v476_v32  ;;  %717 = vmatpush.msra.mxu3 %v476_v32 }
  0x63   : > { %502 = vmatpush.msra.mxu1 %v475_v34  ;;  %718 = vmatpush.msra.mxu3 %v475_v34 }
  0x65   : > { %503 = vmatpush.msra.mxu1 %v474_v35  ;;  %719 = vmatpush.msra.mxu3 %v474_v35 }
  0x67   : > { %504 = vmatpush.msra.mxu1 %v473_v36  ;;  %720 = vmatpush.msra.mxu3 %v473_v36 }
  0x68   : > { %403 = vmatmul.f32.gmra.mxu2 %v360_v19 }
  0xdd   : > { %v398_v37 = vpop.f32.mrf.mxu0 }
  0xde   : > { %v399_v38 = vadd.f32 %v810_v33, %v398_v37 }
  0xe0   : > { %v680_v39 = vmul.f32 -1.702, %v399_v38 }
  0xe2   : > { %v413_v40 = vmul.f32 1.442695, %v680_v39 }
  0xe3   : > { %v401_v41 = vpop.f32.mrf.mxu2 }
  0xe4   : > { %811 = vpow2.f32 %v413_v40  ;;  %v402_v42 = vadd.f32 %v810_v33, %v401_v41 }
  0xe6   : > { %v681_v43 = vmul.f32 -1.702, %v402_v42 }
  0xe8   : > { %v415_v44 = vmul.f32 1.442695, %v681_v43 }
  0xea   : > { %v812_v45 = vpop.eup %811  ;;  %813 = vpow2.f32 %v415_v44 }
  0xeb   : > { %v419_v46 = vadd.f32 1.0, %v812_v45  ;;  %v404_v47 = vpop.f32.mrf.mxu2 }
  0xec   : > { %v405_v48 = vadd.f32 %v810_v33, %v404_v47 }
  0xed   : > { %815 = vrcp.f32 %v419_v46  ;;  %v433_v55 = vand.u32 2147483648, %v419_v46  ;;  %vm427_vm0 = vweird.f32 %v419_v46  ;;  %v431_v57 = vand.u32 2147483647, %v419_v46 }
  0xee   : > { %v682_v49 = vmul.f32 -1.702, %v405_v48 }
  0xef   : > { %v434_v62 = vor.u32 1.1754944e-38, %v433_v55  ;;  %vm432_vm3 = vcmp.eq.f32.partialorder %v431_v57, 8.507059e+37 }
  0xf0   : > { %v814_v50 = vpop.eup %813  ;;  %v417_v51 = vmul.f32 1.442695, %v682_v49 }
  0xf1   : > { %v420_v52 = vadd.f32 1.0, %v814_v50 }
  0xf2   : > { %817 = vpow2.f32 %v417_v51 }
  0xf3   : > { %v816_v53 = vpop.eup %815  ;;  %819 = vrcp.f32 %v420_v52  ;;  %v448_v4 = vand.u32 2147483648, %v420_v52  ;;  %v446_v7 = vand.u32 2147483647, %v420_v52  ;;  %vm442_vm5 = vweird.f32 %v420_v52 }
  0xf4   : > { %v423_v54 = vmul.f32 %v816_v53, %v419_v46  ;;  %vm428_vm1 = vweird.f32 %v816_v53 }
  0xf5   : > { %vm429_vm2 = vmor %vm427_vm0, %vm428_vm1  ;;  %v449_v10 = vor.u32 1.1754944e-38, %v448_v4  ;;  %vm447_vm7 = vcmp.eq.f32.partialorder %v446_v7, 8.507059e+37 }
  0xf6   : > { %v424_v56 = vsub.f32 1.0, %v423_v54 }
  0xf8   : > { %v818_v58 = vpop.eup %817  ;;  %v425_v59 = vmul.f32 %v816_v53, %v424_v56 }
  0xf9   : > { %v820_v60 = vpop.eup %819  ;;  %v421_v61 = vadd.f32 1.0, %v818_v58 }
  0xfa   : > { %v426_v63 = vadd.f32 %v816_v53, %v425_v59  ;;  %v438_v0 = vmul.f32 %v820_v60, %v420_v52  ;;  %vm443_vm4 = vweird.f32 %v820_v60 }
  0xfb   : > { %821 = vrcp.f32 %v421_v61  ;;  %vm444_vm6 = vmor %vm442_vm5, %vm443_vm4  ;;  %v463_v16 = vand.u32 2147483648, %v421_v61  ;;  %v461_v18 = vand.u32 2147483647, %v421_v61  ;;  %vm457_vm9 = vweird.f32 %v421_v61 }
  0xfc   : > { %v430_v1 = vsel %vm429_vm2, %v816_v53, %v426_v63  ;;  %v439_v2 = vsub.f32 1.0, %v438_v0 }
  0xfd   : > { %v435_v3 = vsel %vm432_vm3, %v434_v62, %v430_v1  ;;  %v464_v20 = vor.u32 1.1754944e-38, %v463_v16  ;;  %vm462_vm11 = vcmp.eq.f32.partialorder %v461_v18, 8.507059e+37 }
  0xfe   : > { %v467_v5 = vmul.f32 %v435_v3, %v399_v38  ;;  %v440_v6 = vmul.f32 %v820_v60, %v439_v2 }
 0x100   : > { %505 = vmatmul.f32.vlgmr.msra.gmra.mxu1 %v467_v5  ;;  %v441_v8 = vadd.f32 %v820_v60, %v440_v6 }
 0x101   : > { %v822_v9 = vpop.eup %821 }
 0x102   : > { %v445_v11 = vsel %vm444_vm6, %v820_v60, %v441_v8  ;;  %v453_v12 = vmul.f32 %v822_v9, %v421_v61  ;;  %vm458_vm8 = vweird.f32 %v822_v9 }
 0x103   : > { %v450_v13 = vsel %vm447_vm7, %v449_v10, %v445_v11  ;;  %vm459_vm10 = vmor %vm457_vm9, %vm458_vm8 }
 0x104   : > { %v468_v14 = vmul.f32 %v450_v13, %v402_v42  ;;  %v454_v15 = vsub.f32 1.0, %v453_v12 }
 0x106   : > { %508 = vmatmul.f32.vlgmr.msra.gmra.mxu3 %v468_v14  ;;  %v455_v17 = vmul.f32 %v822_v9, %v454_v15 }
 0x108   : > { %v456_v19 = vadd.f32 %v822_v9, %v455_v17 }
 0x10a   : > { %v460_v21 = vsel %vm459_vm10, %v822_v9, %v456_v19 }
 0x10b   : > { %v465_v22 = vsel %vm462_vm11, %v464_v20, %v460_v21 }
 0x10c   : > { %v469_v23 = vmul.f32 %v465_v22, %v405_v48 }
 0x10e   : > { %511 = vmatmul.f32.gmra.mxu3 %v469_v23 }
 0x17d   : > { %v506_v25 = vpop.f32.mrf.mxu1 }
 0x17e   : > { %v515_v26 = vadd.f32 %v506_v25, %v470_v24 }
 0x180   : > { %518 = vst [vmem:[#allocation2 + $0x10] sm:$0xff] %v515_v26 }
 0x189   : > { %v509_v28 = vpop.f32.mrf.mxu3 }
 0x18a   : > { %v516_v29 = vadd.f32 %v509_v28, %v471_v27 }
 0x18c   : > { %519 = vst [vmem:[#allocation2] sm:$0xff] %v516_v29 }
 0x190   : > { %524 = sbr.rel (%p683_p2) target bundleno = 415 (0x19f), region = 64 }
 0x191   : > { %v512_v31 = vpop.f32.mrf.mxu3 }
 0x192   : > { %v517_v32 = vadd.f32 %v512_v31, %v472_v30 }
 0x194   : > { %520 = vst [vmem:[#allocation2 + $0x8] sm:$0xff] %v517_v32 }
 0x195   : > { %v525_v33 = vld [vmem:[#allocation2 + $0x10] sm:$0xff]  ;;  %v823_v34 = vld [vmem:[%s1283_s4] ss:$0 sm:$0xff] }
 0x196   : > { %v526_v35 = vld [vmem:[#allocation2] sm:$0xff]  ;;  %v532_v37 = vadd.f32 %v823_v34, %v525_v33 }
 0x197   : > { %v533_v38 = vadd.f32 %v823_v34, %v526_v35 }
 0x198   : > { %535 = vst [vmem:[#allocation11] sm:$0xff] %v532_v37 }
 0x199   : > { %536 = vst [vmem:[#allocation11 + $0x8] sm:$0xff] %v533_v38 }
 0x19b   : > { %v527_v36 = vld [vmem:[#allocation2 + $0x8] sm:$0xff] }
 0x19c   : > { %v534_v39 = vadd.f32 %v823_v34, %v527_v36 }
 0x19e   : > { %537 = vst [vmem:[#allocation11 + $0x10] sm:$0xff] %v534_v39 }
 0x19f PF: > { %p752_p3 = scmp.eq.s32.totalorder %s1146_s27, 1  ;;  %s548_s21 = sshll.u32 %s1284_s5, 4  ;;  %s549_s21 = int_to_ptr.hbm [resolvable:$true] %s548_s21 }
 0x1a0   : > { %s1041_s9 = smov [#allocation11]   ;;  %s1042_s16 = smov 128  }
 0x1a1   : > { %s546_s10 = sshll.u32 %s1041_s9, 4  ;;  %s1043_s28 = smov 8   ;;  %s547_s10 = int_to_ptr.vmem [resolvable:$true] %s546_s10 }
 0x1a2   : > { %732 = dma.vmem_to_hbm [thread:$0]  (%p752_p3), %s547_s10, 384, %s549_s21, [#allocation5], %s1042_s16, %s1042_s16, %s1043_s28  }
 0x1a3   : > { %1009 = dma.done.wait (%p752_p3), [#allocation5], 384  }
 0x1a4   : > { %1011 = vsyncadd (%p752_p3), [#allocation5], 4294966912 }
 0x1a5 PF: > { %s23_s23 = sadd.s32 1, %s1034_s23   ;;  %s1297_s27 = sld [smem:[#allocation16_spill]] }
 0x1a6   : > { %p20_p4 = scmp.ge.s32.totalorder %s23_s23, 4   ;;  %s1298_s18 = smov %s1018_s19 }
 0x1a7   : > { %s1299_s19 = smov %s1022_s20  ;;  %s1300_s20 = smov %s1123_s30 }
 0x1a8   : > { %s1301_s21 = smov %s1030_s22  ;;  %22 = sbr.rel (!%p20_p4) target bundleno = 12 (0xc), region = 116 }
 0x1ab   : > { %s1302_s22 = smov %s1297_s27 }
 0x1ad   :  { %565 = vsyncpa [#allocation4], 1 }
 0x1ae   :  { %567 = vsyncpa [#allocation4 + $0x1], 1 }
 0x1af   :  { %568 = vsyncpa [#allocation7], 1 }
 0x1b0   :  { %570 = vsyncpa [#allocation7 + $0x1], 1 }
 0x1b1   :  { %571 = vsyncpa [#allocation10], 1 }
 0x1b2   :  { %573 = vsyncpa [#allocation10 + $0x1], 1 }
 0x1b3   :  { %574 = vsyncpa [#allocation5], 1 }
 0x1b4   :  { %576 = vsyncpa [#allocation5 + $0x1], 1 }

</bundles_post_ra>
